<compile_context>
chip_gen: v7x
topology: tpu7x:2x2x1
jax: 0.10.0
libtpu: 0.0.40
codegen_flags: <defaults>
</compile_context>

<pallas_src>
import math

import jax
import jax.numpy as jnp
from jax.experimental import pallas as pl
from jax.experimental.pallas import tpu as pltpu


def _cross_attention_kernel(x_ref, y_ref,
                            wq_ref, bq_ref,
                            wkv_ref, bkv_ref,
                            w1_ref, b1_ref,
                            w2_ref, b2_ref,
                            out_ref):
    TB, S, D = x_ref.shape
    H = wq_ref.shape[1]

    # ---- batch-tiled, fused projections (fat MXU matmuls) -------------------
    x2 = x_ref[...].reshape(TB * S, D)          # merge batch into the M dim
    y2 = y_ref[...].reshape(TB * S, D)
    # q is pre-scaled by 1/sqrt(H): the scale was folded into wq/bq in the wrapper.
    q = (jnp.dot(x2, wq_ref[...], preferred_element_type=jnp.float32)
         + bq_ref[...]).reshape(TB, S, H)
    kv = (jnp.dot(y2, wkv_ref[...], preferred_element_type=jnp.float32)
          + bkv_ref[...]).reshape(TB, S, 2 * H)
    k = kv[:, :, :H]
    v = kv[:, :, H:]

    # ---- scaled softmax attention (f32) -------------------------------------
    scores = jnp.einsum('bqh,bkh->bqk', q, k,
                        preferred_element_type=jnp.float32)        # (TB, S, S)
    scores = scores - jnp.max(scores, axis=-1, keepdims=True)
    p = jnp.exp(scores)
    denom = jnp.sum(p, axis=-1, keepdims=True)
    attn = p * pl.reciprocal(denom)             # exact reciprocal (keeps f32 accuracy)

    # mean over the query axis hoisted above attn @ v (mean is linear, so exact)
    attn_mean = jnp.mean(attn, axis=1, keepdims=True)              # (TB, 1, S)
    pooled = jnp.einsum('bqs,bsh->bqh', attn_mean, v,
                        preferred_element_type=jnp.float32).reshape(TB, H)

    # ---- projection head: Linear -> ReLU -> Dropout -> Linear ---------------
    # TODO(synk): nn.Dropout(p=0.1) is a no-op here (inference/eval semantics).
    h1 = jnp.maximum(
        jnp.dot(pooled, w1_ref[...], preferred_element_type=jnp.float32)
        + b1_ref[...], 0.0)
    logit = (jnp.dot(h1, w2_ref[...], preferred_element_type=jnp.float32)
             + b2_ref[...])                                        # (TB, 1)

    # 1.0 - sigmoid(-z) == sigmoid(z)
    out_ref[...] = jax.nn.sigmoid(logit)


def _choose_tb(B, S, D, H, budget_bytes):
    """Batch tile so TB*S rows fill the MXU while the working set fits VMEM."""
    tb = min(B, max(1, pl.cdiv(256, S)))

    def est_bytes(t):
        io = 2 * 2 * t * S * D * 4                       # x,y blocks, double-buffered
        act = t * S * (4 * H + 2 * S) * 4                # q, kv, scores, attn (rough)
        wts = 2 * (D * 3 * H + H * H + 5 * H + 2) * 4    # weights + biases
        return io + act + wts

    while tb > 1 and est_bytes(tb) > budget_bytes:
        tb = max(1, tb // 2)
    return tb


def cross_attention_fusion(x, y, params, *, compute_dtype=jnp.float32,
                           vmem_limit_bytes=32 * 1024 * 1024):
    # _fix_shapes: zero-pad the shorter sequence (dim -2) to the longer one.
    diff = y.shape[-2] - x.shape[-2]
    if diff > 0:
        x = jnp.pad(x, ((0, 0), (0, diff), (0, 0)))
    elif diff < 0:
        y = jnp.pad(y, ((0, 0), (0, -diff), (0, 0)))

    B, S, D = x.shape
    H = params["wq"].shape[1]

    # Fold the attention scale into the q projection (free at prep time) and
    # fuse k/v projections into a single (D, 2H) matmul.
    inv_scale = jnp.float32(1.0 / math.sqrt(H))
    wq = params["wq"] * inv_scale
    bq = params["bq"] * inv_scale
    wkv = jnp.concatenate([params["wk"], params["wv"]], axis=1)
    bkv = jnp.concatenate([params["bk"], params["bv"]], axis=1)
    w1, b1, w2, b2 = params["w1"], params["b1"], params["w2"], params["b2"]

    if compute_dtype != jnp.float32:
        # bf16 MXU inputs with f32 accumulation; biases / softmax stay f32.
        x = x.astype(compute_dtype)
        y = y.astype(compute_dtype)
        wq, wkv, w1, w2 = (w.astype(compute_dtype) for w in (wq, wkv, w1, w2))

    # Batch tiling (amortizes per-grid-step overhead, fills the MXU M dim).
    TB = _choose_tb(B, S, D, H, budget_bytes=(3 * vmem_limit_bytes) // 4)
    B_pad = ((B + TB - 1) // TB) * TB
    if B_pad != B:
        x = jnp.pad(x, ((0, B_pad - B), (0, 0), (0, 0)))
        y = jnp.pad(y, ((0, B_pad - B), (0, 0), (0, 0)))

    full = lambda i: (0, 0)   # weights/biases: one untiled block shared by all steps

    out = pl.pallas_call(
        _cross_attention_kernel,
        out_shape=jax.ShapeDtypeStruct((B_pad, 1), jnp.float32),
        grid_spec=pltpu.PrefetchScalarGridSpec(
            num_scalar_prefetch=0,
            grid=(B_pad // TB,),
            in_specs=[
                pl.BlockSpec((TB, S, D), lambda i: (i, 0, 0)),        # x
                pl.BlockSpec((TB, S, D), lambda i: (i, 0, 0)),        # y
                pl.BlockSpec((D, H), full), pl.BlockSpec((1, H), full),          # q proj
                pl.BlockSpec((D, 2 * H), full), pl.BlockSpec((1, 2 * H), full),  # fused kv
                pl.BlockSpec((H, H), full), pl.BlockSpec((1, H), full),          # head 1
                pl.BlockSpec((H, 1), full), pl.BlockSpec((1, 1), full),          # head 2
            ],
            out_specs=pl.BlockSpec((TB, 1), lambda i: (i, 0)),
        ),
        compiler_params=pltpu.CompilerParams(
            dimension_semantics=("parallel",),
            vmem_limit_bytes=vmem_limit_bytes),
    )(x, y, wq, bq, wkv, bkv, w1, b1, w2, b2)
    return out[:B, 0]


def _xavier_uniform(key, fan_in, fan_out):
    # nn.init.xavier_uniform_ on a (fan_out, fan_in) torch weight; we store the
    # transpose (fan_in, fan_out) so the kernel does x @ W.
    bound = math.sqrt(6.0 / (fan_in + fan_out))
    return jax.random.uniform(key, (fan_in, fan_out), jnp.float32, -bound, bound)


def init_params(key, input_dim, hidden_dim):
    ks = jax.random.split(key, 5)
    return {
        "wq": _xavier_uniform(ks[0], input_dim, hidden_dim),
        "bq": jnp.zeros((1, hidden_dim), jnp.float32),
        "wk": _xavier_uniform(ks[1], input_dim, hidden_dim),
        "bk": jnp.zeros((1, hidden_dim), jnp.float32),
        "wv": _xavier_uniform(ks[2], input_dim, hidden_dim),
        "bv": jnp.zeros((1, hidden_dim), jnp.float32),
        "w1": _xavier_uniform(ks[3], hidden_dim, hidden_dim),
        "b1": jnp.zeros((1, hidden_dim), jnp.float32),
        "w2": _xavier_uniform(ks[4], hidden_dim, 1),
        "b2": jnp.zeros((1, 1), jnp.float32),
    }


def reference(x, y, p):
    # Pure-JAX mirror of CrossAttentionFusion.forward (eval mode).
    diff = y.shape[-2] - x.shape[-2]
    if diff > 0:
        x = jnp.pad(x, ((0, 0), (0, diff), (0, 0)))
    elif diff < 0:
        y = jnp.pad(y, ((0, 0), (0, -diff), (0, 0)))
    q = x @ p["wq"] + p["bq"]
    k = y @ p["wk"] + p["bk"]
    v = y @ p["wv"] + p["bv"]
    s = jnp.einsum("bqh,bkh->bqk", q, k) / math.sqrt(k.shape[-1])
    a = jax.nn.softmax(s, axis=-1)
    r = jnp.einsum("bqk,bkh->bqh", a, v)
    pooled = r.mean(axis=1)
    h1 = jax.nn.relu(pooled @ p["w1"] + p["b1"])
    logit = h1 @ p["w2"] + p["b2"]
    return (1.0 - jax.nn.sigmoid(-logit))[:, 0]


if __name__ == "__main__":
    # Small stand-ins for input_dim=768, hidden_dim=128.  After _fix_shapes the
    # shared sequence length is 8 (a multiple of the 8-sublane tile).
    B, Sx, Sy, D, H = 2, 6, 8, 32, 32
    key = jax.random.PRNGKey(0)
    kx, ky, kp = jax.random.split(key, 3)
    x = jax.random.normal(kx, (B, Sx, D), jnp.float32)
    y = jax.random.normal(ky, (B, Sy, D), jnp.float32)
    params = init_params(kp, D, H)

    out = cross_attention_fusion(x, y, params)
    out = jax.block_until_ready(out)

    ref = reference(x, y, params)
    assert out.shape == (B,), out.shape
    assert jnp.allclose(out, ref, rtol=1e-5, atol=1e-5), (out, ref)
    print("KERNEL_OK")
</pallas_src>

<mosaic_0001>
module attributes {stable_mosaic.version = 11 : i64} {
  func.func @_cross_attention_kernel(%arg0: i32, %arg1: memref<2x8x32xf32, #tpu.memory_space<vmem>>, %arg2: memref<2x8x32xf32, #tpu.memory_space<vmem>>, %arg3: memref<32x32xf32, #tpu.memory_space<vmem>>, %arg4: memref<1x32xf32, #tpu.memory_space<vmem>>, %arg5: memref<32x64xf32, #tpu.memory_space<vmem>>, %arg6: memref<1x64xf32, #tpu.memory_space<vmem>>, %arg7: memref<32x32xf32, #tpu.memory_space<vmem>>, %arg8: memref<1x32xf32, #tpu.memory_space<vmem>>, %arg9: memref<32x1xf32, #tpu.memory_space<vmem>>, %arg10: memref<1x1xf32, #tpu.memory_space<vmem>>, %arg11: memref<2x1xf32, #tpu.memory_space<vmem>>) attributes {dimension_semantics = [#tpu.dimension_semantics<parallel>], iteration_bounds = array<i64: 1>, scalar_prefetch = 0 : i64, scratch_operands = 0 : i64, tpu.core_type = #tpu.core_type<tc>, window_params = [{transform_indices = @transform_0, window_bounds = array<i64: 2, 8, 32>}, {transform_indices = @transform_1, window_bounds = array<i64: 2, 8, 32>}, {pipeline_mode = #tpu.pipeline_mode<synchronous>, transform_indices = @transform_2, window_bounds = array<i64: 32, 32>}, {pipeline_mode = #tpu.pipeline_mode<synchronous>, transform_indices = @transform_3, window_bounds = array<i64: 1, 32>}, {pipeline_mode = #tpu.pipeline_mode<synchronous>, transform_indices = @transform_4, window_bounds = array<i64: 32, 64>}, {pipeline_mode = #tpu.pipeline_mode<synchronous>, transform_indices = @transform_5, window_bounds = array<i64: 1, 64>}, {pipeline_mode = #tpu.pipeline_mode<synchronous>, transform_indices = @transform_6, window_bounds = array<i64: 32, 32>}, {pipeline_mode = #tpu.pipeline_mode<synchronous>, transform_indices = @transform_7, window_bounds = array<i64: 1, 32>}, {pipeline_mode = #tpu.pipeline_mode<synchronous>, transform_indices = @transform_8, window_bounds = array<i64: 32, 1>}, {pipeline_mode = #tpu.pipeline_mode<synchronous>, transform_indices = @transform_9, window_bounds = array<i64: 1, 1>}, {transform_indices = @transform_10, window_bounds = array<i64: 2, 1>}]} {
    %c0 = arith.constant 0 : index
    %c0_0 = arith.constant 0 : index
    %c0_1 = arith.constant 0 : index
    %0 = vector.load %arg1[%c0, %c0_0, %c0_1] : memref<2x8x32xf32, #tpu.memory_space<vmem>>, vector<2x8x32xf32>
    %1 = vector.shape_cast %0 : vector<2x8x32xf32> to vector<16x32xf32>
    %c0_2 = arith.constant 0 : index
    %c0_3 = arith.constant 0 : index
    %c0_4 = arith.constant 0 : index
    %2 = vector.load %arg2[%c0_2, %c0_3, %c0_4] : memref<2x8x32xf32, #tpu.memory_space<vmem>>, vector<2x8x32xf32>
    %3 = vector.shape_cast %2 : vector<2x8x32xf32> to vector<16x32xf32>
    %c0_5 = arith.constant 0 : index
    %c0_6 = arith.constant 0 : index
    %4 = vector.load %arg3[%c0_5, %c0_6] : memref<32x32xf32, #tpu.memory_space<vmem>>, vector<32x32xf32>
    %cst = arith.constant dense<0.000000e+00> : vector<16x32xf32>
    %5 = tpu.matmul %1, %4, %cst {dimension_numbers = #tpu.dot_dimension_numbers<[1], [0], [0], [1], [0, 0, 1, 1], [], []>} : vector<16x32xf32>, vector<32x32xf32>, vector<16x32xf32> -> vector<16x32xf32>
    %c0_7 = arith.constant 0 : index
    %c0_8 = arith.constant 0 : index
    %6 = vector.load %arg4[%c0_7, %c0_8] : memref<1x32xf32, #tpu.memory_space<vmem>>, vector<1x32xf32>
    %7 = vector.broadcast %6 : vector<1x32xf32> to vector<16x32xf32>
    %8 = arith.addf %5, %7 : vector<16x32xf32>
    %9 = vector.shape_cast %8 : vector<16x32xf32> to vector<2x8x32xf32>
    %c0_9 = arith.constant 0 : index
    %c0_10 = arith.constant 0 : index
    %10 = vector.load %arg5[%c0_9, %c0_10] : memref<32x64xf32, #tpu.memory_space<vmem>>, vector<32x64xf32>
    %cst_11 = arith.constant dense<0.000000e+00> : vector<16x64xf32>
    %11 = tpu.matmul %3, %10, %cst_11 {dimension_numbers = #tpu.dot_dimension_numbers<[1], [0], [0], [1], [0, 0, 1, 1], [], []>} : vector<16x32xf32>, vector<32x64xf32>, vector<16x64xf32> -> vector<16x64xf32>
    %c0_12 = arith.constant 0 : index
    %c0_13 = arith.constant 0 : index
    %12 = vector.load %arg6[%c0_12, %c0_13] : memref<1x64xf32, #tpu.memory_space<vmem>>, vector<1x64xf32>
    %13 = vector.broadcast %12 : vector<1x64xf32> to vector<16x64xf32>
    %14 = arith.addf %11, %13 : vector<16x64xf32>
    %15 = vector.shape_cast %14 : vector<16x64xf32> to vector<2x8x64xf32>
    %16 = vector.extract_strided_slice %15 {offsets = [0, 0, 0], sizes = [2, 8, 32], strides = [1, 1, 1]} : vector<2x8x64xf32> to vector<2x8x32xf32>
    %17 = vector.extract_strided_slice %15 {offsets = [0, 0, 32], sizes = [2, 8, 32], strides = [1, 1, 1]} : vector<2x8x64xf32> to vector<2x8x32xf32>
    "tpu.trace_start"() <{level = 10 : i32, message = "bqh,bkh->bqk"}> : () -> ()
    %cst_14 = arith.constant dense<0.000000e+00> : vector<2x8x8xf32>
    %18 = tpu.matmul %9, %16, %cst_14 {dimension_numbers = #tpu.dot_dimension_numbers<[2], [2], [1], [1], [0, 0, 0, 1, 1, 1], [0], [0]>} : vector<2x8x32xf32>, vector<2x8x32xf32>, vector<2x8x8xf32> -> vector<2x8x8xf32>
    "tpu.trace_stop"() : () -> ()
    %cst_15 = arith.constant dense<0xFF800000> : vector<2x8xf32>
    %19 = vector.multi_reduction <maximumf>, %18, %cst_15 [2] : vector<2x8x8xf32> to vector<2x8xf32>
    %20 = vector.shape_cast %19 : vector<2x8xf32> to vector<2x8x1xf32>
    %21 = vector.broadcast %20 : vector<2x8x1xf32> to vector<2x8x8xf32>
    %22 = arith.subf %18, %21 : vector<2x8x8xf32>
    %23 = math.exp %22 : vector<2x8x8xf32>
    %cst_16 = arith.constant dense<0.000000e+00> : vector<2x8xf32>
    %24 = vector.multi_reduction <add>, %23, %cst_16 [2] : vector<2x8x8xf32> to vector<2x8xf32>
    %25 = vector.shape_cast %24 : vector<2x8xf32> to vector<2x8x1xf32>
    %26 = tpu.reciprocal %25 : vector<2x8x1xf32> -> vector<2x8x1xf32>
    %27 = vector.broadcast %26 : vector<2x8x1xf32> to vector<2x8x8xf32>
    %28 = arith.mulf %23, %27 : vector<2x8x8xf32>
    %cst_17 = arith.constant dense<0.000000e+00> : vector<2x8xf32>
    %29 = vector.multi_reduction <add>, %28, %cst_17 [1] : vector<2x8x8xf32> to vector<2x8xf32>
    %30 = vector.shape_cast %29 : vector<2x8xf32> to vector<2x1x8xf32>
    %cst_18 = arith.constant 8.000000e+00 : f32
    %31 = vector.broadcast %cst_18 : f32 to vector<2x1x8xf32>
    %32 = arith.divf %30, %31 : vector<2x1x8xf32>
    "tpu.trace_start"() <{level = 10 : i32, message = "bqs,bsh->bqh"}> : () -> ()
    %cst_19 = arith.constant dense<0.000000e+00> : vector<2x1x32xf32>
    %33 = tpu.matmul %32, %17, %cst_19 {dimension_numbers = #tpu.dot_dimension_numbers<[2], [1], [1], [2], [0, 0, 0, 1, 1, 2], [0], [0]>} : vector<2x1x8xf32>, vector<2x8x32xf32>, vector<2x1x32xf32> -> vector<2x1x32xf32>
    "tpu.trace_stop"() : () -> ()
    %34 = vector.shape_cast %33 : vector<2x1x32xf32> to vector<2x32xf32>
    %c0_20 = arith.constant 0 : index
    %c0_21 = arith.constant 0 : index
    %35 = vector.load %arg7[%c0_20, %c0_21] : memref<32x32xf32, #tpu.memory_space<vmem>>, vector<32x32xf32>
    %cst_22 = arith.constant dense<0.000000e+00> : vector<2x32xf32>
    %36 = tpu.matmul %34, %35, %cst_22 {dimension_numbers = #tpu.dot_dimension_numbers<[1], [0], [0], [1], [0, 0, 1, 1], [], []>} : vector<2x32xf32>, vector<32x32xf32>, vector<2x32xf32> -> vector<2x32xf32>
    %c0_23 = arith.constant 0 : index
    %c0_24 = arith.constant 0 : index
    %37 = vector.load %arg8[%c0_23, %c0_24] : memref<1x32xf32, #tpu.memory_space<vmem>>, vector<1x32xf32>
    %38 = vector.broadcast %37 : vector<1x32xf32> to vector<2x32xf32>
    %39 = arith.addf %36, %38 : vector<2x32xf32>
    %cst_25 = arith.constant 0.000000e+00 : f32
    %40 = vector.broadcast %cst_25 : f32 to vector<2x32xf32>
    %41 = arith.maximumf %39, %40 : vector<2x32xf32>
    %c0_26 = arith.constant 0 : index
    %c0_27 = arith.constant 0 : index
    %42 = vector.load %arg9[%c0_26, %c0_27] : memref<32x1xf32, #tpu.memory_space<vmem>>, vector<32x1xf32>
    %cst_28 = arith.constant dense<0.000000e+00> : vector<2x1xf32>
    %43 = tpu.matmul %41, %42, %cst_28 {dimension_numbers = #tpu.dot_dimension_numbers<[1], [0], [0], [1], [0, 0, 1, 1], [], []>} : vector<2x32xf32>, vector<32x1xf32>, vector<2x1xf32> -> vector<2x1xf32>
    %c0_29 = arith.constant 0 : index
    %c0_30 = arith.constant 0 : index
    %44 = vector.load %arg10[%c0_29, %c0_30] : memref<1x1xf32, #tpu.memory_space<vmem>>, vector<1x1xf32>
    %45 = vector.broadcast %44 : vector<1x1xf32> to vector<2x1xf32>
    %46 = arith.addf %43, %45 : vector<2x1xf32>
    %47 = arith.negf %46 : vector<2x1xf32>
    %48 = math.exp %47 : vector<2x1xf32>
    %cst_31 = arith.constant 1.000000e+00 : f32
    %49 = vector.broadcast %cst_31 : f32 to vector<2x1xf32>
    %50 = arith.addf %49, %48 : vector<2x1xf32>
    %51 = arith.divf %49, %50 : vector<2x1xf32>
    %c0_32 = arith.constant 0 : index
    %c0_33 = arith.constant 0 : index
    %52 = vector.load %arg11[%c0_32, %c0_33] : memref<2x1xf32, #tpu.memory_space<vmem>>, vector<2x1xf32>
    tpu.vector_store %arg11[%c0_32, %c0_33], %51 {strides = array<i32>} : memref<2x1xf32, #tpu.memory_space<vmem>>, vector<2x1xf32>,
    return
  }
  func.func @transform_0(%arg0: i32) -> (i32, i32, i32) {
    %c0_i32 = arith.constant 0 : i32
    %c0_i32_0 = arith.constant 0 : i32
    %c0_i32_1 = arith.constant 0 : i32
    return %arg0, %c0_i32, %c0_i32_0 : i32, i32, i32
  }
  func.func @transform_1(%arg0: i32) -> (i32, i32, i32) {
    %c0_i32 = arith.constant 0 : i32
    %c0_i32_0 = arith.constant 0 : i32
    %c0_i32_1 = arith.constant 0 : i32
    return %arg0, %c0_i32, %c0_i32_0 : i32, i32, i32
  }
  func.func @transform_2(%arg0: i32) -> (i32, i32) {
    %c0_i32 = arith.constant 0 : i32
    %c0_i32_0 = arith.constant 0 : i32
    %c0_i32_1 = arith.constant 0 : i32
    return %c0_i32, %c0_i32_0 : i32, i32
  }
  func.func @transform_3(%arg0: i32) -> (i32, i32) {
    %c0_i32 = arith.constant 0 : i32
    %c0_i32_0 = arith.constant 0 : i32
    %c0_i32_1 = arith.constant 0 : i32
    return %c0_i32, %c0_i32_0 : i32, i32
  }
  func.func @transform_4(%arg0: i32) -> (i32, i32) {
    %c0_i32 = arith.constant 0 : i32
    %c0_i32_0 = arith.constant 0 : i32
    %c0_i32_1 = arith.constant 0 : i32
    return %c0_i32, %c0_i32_0 : i32, i32
  }
  func.func @transform_5(%arg0: i32) -> (i32, i32) {
    %c0_i32 = arith.constant 0 : i32
    %c0_i32_0 = arith.constant 0 : i32
    %c0_i32_1 = arith.constant 0 : i32
    return %c0_i32, %c0_i32_0 : i32, i32
  }
  func.func @transform_6(%arg0: i32) -> (i32, i32) {
    %c0_i32 = arith.constant 0 : i32
    %c0_i32_0 = arith.constant 0 : i32
    %c0_i32_1 = arith.constant 0 : i32
    return %c0_i32, %c0_i32_0 : i32, i32
  }
  func.func @transform_7(%arg0: i32) -> (i32, i32) {
    %c0_i32 = arith.constant 0 : i32
    %c0_i32_0 = arith.constant 0 : i32
    %c0_i32_1 = arith.constant 0 : i32
    return %c0_i32, %c0_i32_0 : i32, i32
  }
  func.func @transform_8(%arg0: i32) -> (i32, i32) {
    %c0_i32 = arith.constant 0 : i32
    %c0_i32_0 = arith.constant 0 : i32
    %c0_i32_1 = arith.constant 0 : i32
    return %c0_i32, %c0_i32_0 : i32, i32
  }
  func.func @transform_9(%arg0: i32) -> (i32, i32) {
    %c0_i32 = arith.constant 0 : i32
    %c0_i32_0 = arith.constant 0 : i32
    %c0_i32_1 = arith.constant 0 : i32
    return %c0_i32, %c0_i32_0 : i32, i32
  }
  func.func @transform_10(%arg0: i32) -> (i32, i32) {
    %c0_i32 = arith.constant 0 : i32
    %c0_i32_0 = arith.constant 0 : i32
    return %arg0, %c0_i32 : i32, i32
  }
}

</mosaic_0001>

<bundles_post_ra>
// kernel: tpu_custom_call.1
= control target key start
LH: loop header
LB: loop body
LE: loop exit
PB: predicated region body
PF: predicated region fallthrough
CT: control target
= control target key end

     0   :  { %s1280_s0 = inlined_call_operand.hbm [shape: f32[2,8,32], index: 0, kind: input, shape index: {}]   ;;  %s1281_s1 = inlined_call_operand.hbm [shape: f32[2,8,32], index: 1, kind: input, shape index: {}]   ;;  %s1282_s2 = inlined_call_operand.vmem [shape: f32[32,32], index: 2, kind: input, shape index: {}]   ;;  %s1283_s3 = inlined_call_operand.vmem [shape: f32[1,32], index: 3, kind: input, shape index: {}]   ;;  %s1284_s4 = inlined_call_operand.hbm [shape: f32[32,64], index: 4, kind: input, shape index: {}]   ;;  %s1285_s5 = inlined_call_operand.vmem [shape: f32[1,64], index: 5, kind: input, shape index: {}]   ;;  %s1286_s6 = inlined_call_operand.hbm [shape: f32[32,32], index: 6, kind: input, shape index: {}]   ;;  %s1287_s7 = inlined_call_operand.vmem [shape: f32[1,32], index: 7, kind: input, shape index: {}]   ;;  %s1288_s8 = inlined_call_operand.vmem [shape: f32[32,1], index: 8, kind: input, shape index: {}]   ;;  %s1289_s9 = inlined_call_operand.<no memory space> [shape: f32[1,1], index: 9, kind: input, shape index: {}]   ;;  %s1290_s10 = inlined_call_operand.vmem [shape: f32[2,1], index: 10, kind: output, shape index: {}]  }
   0x1   :  { %v15_v0 = vstv %s1289_s9 }
   0x2   :  { %16 = vst [vmem:[#allocation2] sm:$0x1] %v15_v0 }
   0x3   :  { %17 = vsyncpa [#allocation4], 0 }
   0x4   :  { %18 = vsyncpa [#allocation6], 0 }
   0x5   :  { %19 = vsyncpa [#allocation9], 0  ;;  %s1068_s15 = smov [#allocation5]   ;;  %s1069_s17 = smov [#allocation3]  }
   0x6   :  { %s37_s16 = sshll.u32 %s1068_s15, 4  ;;  %s25_s18 = sshll.u32 %s1069_s17, 4  ;;  %s38_s16 = int_to_ptr.vmem [resolvable:$true] %s37_s16  ;;  %s1136_s18 = int_to_ptr.vmem [resolvable:$true] %s25_s18 }
   0x7   :  { %s974_s21 = scalar_lea.hbm %s1281_s1, 256 }
   0x8   :  { %p975_p0 = scmp.ne.s32.totalorder %s1281_s1, %s974_s21  ;;  %p978_p1 = scmp.lt.u32.totalorder %s974_s21, %s1281_s1 }
   0xa   :  { %p980_p2 = pnand %p978_p1, %p975_p0 }
   0xc   :  { %983 = shalt.err (!%p980_p2)
}
   0xd   :  { %s984_s25 = scalar_lea.vmem %s38_s16, 256  ;;  %p989_p4 = scmp.lt.s32.totalorder %s38_s16, %s38_s16 }
   0xe   :  { %p985_p3 = scmp.ne.s32.totalorder %s38_s16, %s984_s25  ;;  %p990_p5 = scmp.lt.s32.totalorder %s984_s25, %s984_s25 }
  0x10   :  { %p991_p6 = por %p990_p5, %p989_p4 }
  0x12   :  { %p992_p7 = pnand %p991_p6, %p985_p3 }
  0x14   :  { %995 = shalt.err (!%p992_p7)
}
  0x15   :  { %s1070_s26 = smov 128   ;;  %s1071_s27 = smov 8  }
  0x16   :  { %43 = dma.hbm_to_vmem [thread:$0]  %s1281_s1, 256, %s38_s16, [#allocation6], %s1070_s26, %s1070_s26, %s1071_s27  }
  0x17   :  { %s996_s12 = scalar_lea.hbm %s1280_s0, 256 }
  0x18   :  { %p997_p8 = scmp.ne.s32.totalorder %s1280_s0, %s996_s12  ;;  %p1000_p9 = scmp.lt.u32.totalorder %s996_s12, %s1280_s0 }
  0x1a   :  { %p1002_p10 = pnand %p1000_p9, %p997_p8 }
  0x1c   :  { %1005 = shalt.err (!%p1002_p10)
}
  0x1d   :  { %s1006_s19 = scalar_lea.vmem %s1136_s18, 256  ;;  %p1011_p12 = scmp.lt.s32.totalorder %s1136_s18, %s1136_s18 }
  0x1e   :  { %p1007_p11 = scmp.ne.s32.totalorder %s1136_s18, %s1006_s19  ;;  %p1012_p13 = scmp.lt.s32.totalorder %s1006_s19, %s1006_s19 }
  0x20   :  { %p1013_p0 = por %p1012_p13, %p1011_p12 }
  0x22   :  { %p1014_p1 = pnand %p1013_p0, %p1007_p11 }
  0x24   :  { %1017 = shalt.err (!%p1014_p1)
}
  0x25   :  { %31 = dma.hbm_to_vmem [thread:$0]  %s1280_s0, 256, %s1136_s18, [#allocation4], %s1070_s26, %s1070_s26, %s1071_s27  }
  0x26   :  { %s1072_s20 = smov [#allocation7]   ;;  %s1073_s22 = smov [#allocation8]  }
  0x27   :  { %s53_s21 = sshll.u32 %s1072_s20, 4  ;;  %s67_s23 = sshll.u32 %s1073_s22, 4  ;;  %s54_s21 = int_to_ptr.vmem [resolvable:$true] %s53_s21  ;;  %s1173_s23 = int_to_ptr.vmem [resolvable:$true] %s67_s23 }
  0x28   :  { %s1018_s25 = scalar_lea.hbm %s1284_s4, 512 }
  0x29   :  { %p1019_p2 = scmp.ne.s32.totalorder %s1284_s4, %s1018_s25  ;;  %p1022_p3 = scmp.lt.u32.totalorder %s1018_s25, %s1284_s4 }
  0x2b   :  { %p1024_p4 = pnand %p1022_p3, %p1019_p2 }
  0x2d   :  { %1027 = shalt.err (!%p1024_p4)
}
  0x2e   :  { %s1028_s0 = scalar_lea.vmem %s54_s21, 512  ;;  %p1033_p6 = scmp.lt.s32.totalorder %s54_s21, %s54_s21 }
  0x2f   :  { %p1029_p5 = scmp.ne.s32.totalorder %s54_s21, %s1028_s0  ;;  %p1034_p7 = scmp.lt.s32.totalorder %s1028_s0, %s1028_s0 }
  0x31   :  { %p1035_p8 = por %p1034_p7, %p1033_p6 }
  0x33   :  { %p1036_p9 = pnand %p1035_p8, %p1029_p5 }
  0x35   :  { %1039 = shalt.err (!%p1036_p9)
}
  0x36   :  { %59 = dma.hbm_to_vmem [thread:$0]  %s1284_s4, 512, %s54_s21, [#allocation6], %s1070_s26, %s1070_s26, %s1071_s27  }
  0x37   :  { %s1040_s15 = scalar_lea.hbm %s1286_s6, 512 }
  0x38   :  { %p1041_p10 = scmp.ne.s32.totalorder %s1286_s6, %s1040_s15  ;;  %p1044_p11 = scmp.lt.u32.totalorder %s1040_s15, %s1286_s6 }
  0x3a   :  { %p1046_p12 = pnand %p1044_p11, %p1041_p10 }
  0x3c   :  { %1049 = shalt.err (!%p1046_p12)
}
  0x3d   :  { %s1050_s20 = scalar_lea.vmem %s1173_s23, 512  ;;  %p1055_p0 = scmp.lt.s32.totalorder %s1173_s23, %s1173_s23 }
  0x3e   :  { %p1051_p13 = scmp.ne.s32.totalorder %s1173_s23, %s1050_s20  ;;  %p1056_p1 = scmp.lt.s32.totalorder %s1050_s20, %s1050_s20 }
  0x40   :  { %p1057_p2 = por %p1056_p1, %p1055_p0 }
  0x42   :  { %p1058_p3 = pnand %p1057_p2, %p1051_p13 }
  0x44   :  { %1061 = shalt.err (!%p1058_p3)
}
  0x45   :  { %73 = dma.hbm_to_vmem [thread:$0]  %s1286_s6, 512, %s1173_s23, [#allocation9], %s1070_s26, %s1070_s26, %s1071_s27  }
  0x46   :  { %1062 = dma.done.wait [#allocation4], 256  }
  0x47   :  { %1063 = vsyncadd [#allocation4], 4294967040 }
  0x48   :  { %1064 = dma.done.wait [#allocation6], 768  }
  0x49   :  { %1065 = vsyncadd [#allocation6], 4294966528 }
  0x4a   :  { %1066 = dma.done.wait [#allocation9], 512  }
  0x4b   :  { %1067 = vsyncadd [#allocation9], 4294966784  ;;  %v189_v1 = vld [vmem:[#allocation7] sm:$0xff]  ;;  %v190_v2 = vld [vmem:[#allocation7 + $0x8] sm:$0xff]  ;;  %vm107_vm0 = vcmask 261120   ;;  %v1074_v17 = vmov 0.0  }
  0x4c   :  { %v96_v3 = vld [vmem:[%s1282_s2] sm:$0xff]  ;;  %v932_v4 = vpack.c.bf16 %v190_v2, %v189_v1  ;;  %v97_v5 = vld [vmem:[%s1282_s2 + $0x8] sm:$0xff]  ;;  %v191_v6 = vld [vmem:[#allocation7 + $0x10] sm:$0xff]  ;;  %vm1075_vm1 = vmmov 0   ;;  %vm433_vm2 = vcmask 64512   ;;  %v1077_v45 = vmov 0.0|0.0  }
  0x4d   :  { %v192_v7 = vld [vmem:[#allocation7 + $0x18] sm:$0xff]  ;;  %v924_v8 = vpack.c.bf16 %v97_v5, %v96_v3  ;;  %v98_v10 = vld [vmem:[%s1282_s2 + $0x10] sm:$0xff]  ;;  %v92_v14 = vld [vmem:[#allocation3] sm:$0xff]  ;;  %vm639_vm3 = vcmask 1041409   ;;  %vm804_vm4 = vcmask 1024  }
  0x4e   :  { %v936_v9 = vpack.c.bf16 %v192_v7, %v191_v6  ;;  %v99_v11 = vld [vmem:[%s1282_s2 + $0x18] sm:$0xff]  ;;  %933 = vmatprep.subr.bf16.mxu1 %v932_v4  ;;  %868 = vmatprep.mubr.msk.f32.mxu0 %vm107_vm0, %v92_v14  ;;  %v93_v16 = vld [vmem:[#allocation3 + $0x8] sm:$0xff]  ;;  %v816_v18 = vld [vmem:[%s1285_s5] ss:$0 sm:$0xff] }
  0x4f   :  { %v94_v12 = vld [vmem:[#allocation5] sm:$0xff]  ;;  %v928_v13 = vpack.c.bf16 %v99_v11, %v98_v10  ;;  %935 = vmatpush3.bf16.msra.mxu1 %v932_v4  ;;  %925 = vmatprep.subr.bf16.mxu0 %v924_v8  ;;  %v95_v15 = vld [vmem:[#allocation5 + $0x8] sm:$0xff]  ;;  %v625_v3 = vld [vmem:[#allocation8] sm:$0xff] }
  0x50   :  { %879 = vmatprep.mubr.msk.f32.mxu1 %vm107_vm0, %v94_v12  ;;  %927 = vmatpush3.bf16.msra.mxu0 %v924_v8  ;;  %v813_v19 = vld [vmem:[%s1283_s3] ss:$0 sm:$0xff]  ;;  %s1076_s3 = smov 96   ;;  %v626_v4 = vld [vmem:[#allocation8 + $0x8] sm:$0xff]  ;;  %v627_v8 = vld [vmem:[#allocation8 + $0x10] sm:$0xff] }
  0x51   :  { %937 = vmatprep.subr.bf16.mxu1 %v936_v9  ;;  %929 = vmatprep.subr.bf16.mxu0 %v928_v13  ;;  %v941_v6 = vpack.c.bf16 %v626_v4, %v625_v3  ;;  %v714_v11 = vld [vmem:[%s1288_s8] sm:$0xff]  ;;  %v715_v12 = vld [vmem:[%s1288_s8 + $0x8] sm:$0xff] }
  0x53   :  { %939 = vmatpush3.bf16.msra.mxu1 %v936_v9  ;;  %v628_v9 = vld [vmem:[#allocation8 + $0x18] sm:$0xff] }
  0x54   :  { %931 = vmatpush3.bf16.msra.mxu0 %v928_v13  ;;  %887 = vmatprep.subr.mxu1 %v1074_v17  ;;  %v944_v10 = vpack.c.bf16 %v628_v9, %v627_v8  ;;  %v947_v13 = vpack.c.bf16 %v715_v12, %v714_v11 }
  0x55   :  { %882 = vmatprep.subr.mxu0 %v1074_v17 }
  0x56   :  { %880 = vmatmul.mubr.msk.f32.vlgmr.msra.gmra.mrb[0].mxu1 %vm107_vm0, %v95_v15 }
  0x57   :  { %869 = vmatmul.mubr.msk.f32.vlgmr.msra.gmra.mrb[0].mxu0 %vm107_vm0, %v93_v16  ;;  %889 = vmatprep.mubr.msk.f32.mxu1 %vm1075_vm1, %v1074_v17 }
  0x58   :  { %884 = vmatprep.mubr.msk.f32.mxu0 %vm1075_vm1, %v1074_v17 }
 0x129   :  { %v881_v20 = vpop.f32.mrb[0].mxu1 }
 0x12a   :  { %v278_v21 = vadd.f32 %v881_v20, %v816_v18  ;;  %v272_v22 = vpop.f32.mrb[1].mxu1  ;;  %v870_v23 = vpop.f32.mrb[0].mxu0  ;;  %v716_v20 = vld [vmem:[%s1288_s8 + $0x10] sm:$0xff] }
 0x12b   :  { %v273_v24 = vadd.f32 %v816_v18, %v272_v22  ;;  %v186_v25 = vadd.f32 %v870_v23, %v813_v19  ;;  %v180_v26 = vpop.f32.mrb[1].mxu0  ;;  %v825_v23 = vld [vmem:[%s1287_s7] ss:$0 sm:$0xff] }
 0x12c   :  { %888 = vmatpush3.xpose.msk.msra.mxu1 %vm107_vm0, %v278_v21  ;;  %v181_v27 = vadd.f32 %v813_v19, %v180_v26 }
 0x12d   :  { %883 = vmatpush3.xpose.msk.msra.mxu0 %vm107_vm0, %v273_v24  ;;  %897 = vmatprep.subr.mxu1 %v1074_v17 }
 0x12e   :  { %892 = vmatprep.subr.mxu0 %v1074_v17 }
 0x12f   :  { %890 = vmatmul.mubr.msk.f32.vlgmr.msra.gmra.mrb[2].mxu1 %vm107_vm0, %v186_v25 }
 0x130   :  { %885 = vmatmul.mubr.msk.f32.vlgmr.msra.gmra.mrb[2].mxu0 %vm107_vm0, %v181_v27  ;;  %899 = vmatprep.mubr.msk.f32.mxu1 %vm1075_vm1, %v1074_v17 }
 0x131   :  { %894 = vmatprep.mubr.msk.f32.mxu0 %vm1075_vm1, %v1074_v17 }
 0x202   :  { %v429_v28 = vpop.f32.mrb[2].mxu1 }
 0x203   :  { %v353_v29 = vpop.f32.mrb[2].mxu0  ;;  %v891_v30 = vpop.f32.mrb[3].mxu1  ;;  %v437_v31 = vsel %vm433_vm2, %v429_v28, -inf }
 0x204   :  { %438 = vmax.xlane.f32.xlu0 %v437_v31  ;;  %v886_v32 = vpop.f32.mrb[3].mxu0  ;;  %v434_v33 = vsel %vm433_vm2, %v353_v29, -inf }
 0x208   :  { %435 = vmax.xlane.f32.xlu0 %v434_v33 }
 0x21e   :  { %549 = vrot.lane.b32.xlu0 %v278_v21, %s1076_s3  ;;  %v717_v21 = vld [vmem:[%s1288_s8 + $0x18] sm:$0xff] }
 0x21f   :  { %v950_v22 = vpack.c.bf16 %v717_v21, %v716_v20 }
 0x291   :  { %v439_v34 = vpop.xlane.xlu0 %438 }
 0x292   :  { %v441_v35 = vsub.f32 %v429_v28, %v439_v34  ;;  %v827_v28 = vld [vmem:[#allocation2] ss:$0 sm:$0xff] }
 0x294   :  { %v444_v36 = vmul.f32 1.442695, %v441_v35 }
 0x295   :  { %v436_v37 = vpop.xlane.xlu0 %435 }
 0x296   :  { %962 = vpow2.f32 %v444_v36  ;;  %v440_v38 = vsub.f32 %v353_v29, %v436_v37 }
 0x298   :  { %v442_v39 = vmul.f32 1.442695, %v440_v38 }
 0x299   :  { %v550_v40 = vpop.permute.xlu0 %549 }
 0x29a   :  { %964 = vpow2.f32 %v442_v39  ;;  %898 = vmatpush3.msra.mxu1 %v550_v40 }
 0x29b   :  { %946 = vmatprep.subr.bf16.mxu1 %v1077_v45 }
 0x2a0   :  { %v963_v41 = vpop.eup %962 }
 0x2a1   :  { %v449_v42 = vsel %vm433_vm2, %v963_v41, 0.0 }
 0x2a2   :  { %450 = vadd.xlane.f32.xlu1 %v449_v42 }
 0x2a4   :  { %v965_v43 = vpop.eup %964 }
 0x2a5   :  { %v446_v44 = vsel %vm433_vm2, %v965_v43, 0.0 }
 0x2a6   :  { %447 = vadd.xlane.f32.xlu1 %v446_v44 }
 0x2b7   :  { %473 = vrot.lane.b32.xlu1 %v273_v24, %s1076_s3 }
 0x32f   :  { %v451_v46 = vpop.xlane.xlu1 %450 }
 0x330   :  { %966 = vrcp.f32 %v451_v46 }
 0x333   :  { %v448_v47 = vpop.xlane.xlu1 %447 }
 0x334   :  { %968 = vrcp.f32 %v448_v47 }
 0x337   :  { %v474_v48 = vpop.permute.xlu1 %473 }
 0x338   :  { %893 = vmatpush3.msra.mxu0 %v474_v48 }
 0x339   :  { %940 = vmatprep.subr.bf16.mxu0 %v1077_v45 }
 0x33a   :  { %v967_v49 = vpop.eup %966 }
 0x33b   :  { %v455_v50 = vmul.f32 %v967_v49, %v963_v41 }
 0x33d   :  { %v463_v51 = vsel %vm433_vm2, %v455_v50, 0.0 }
 0x33e   :  { %v969_v52 = vpop.eup %968  ;;  %v464_v53 = vrot.slane %v463_v51, 4 }
 0x33f   :  { %v454_v54 = vmul.f32 %v969_v52, %v965_v43 }
 0x340   :  { %v465_v55 = vadd.f32 %v464_v53, %v463_v51 }
 0x341   :  { %v456_v56 = vsel %vm433_vm2, %v454_v54, 0.0 }
 0x342   :  { %v457_v57 = vrot.slane %v456_v56, 4  ;;  %v466_v58 = vrot.slane %v465_v55, 2 }
 0x344   :  { %v458_v59 = vadd.f32 %v457_v57, %v456_v56  ;;  %v467_v60 = vadd.f32 %v466_v58, %v465_v55 }
 0x346   :  { %v468_v61 = vrot.slane %v467_v60, 1  ;;  %v459_v62 = vrot.slane %v458_v59, 2 }
 0x348   :  { %v469_v63 = vadd.f32 %v468_v61, %v467_v60  ;;  %v460_v0 = vadd.f32 %v459_v62, %v458_v59 }
 0x34a   :  { %v472_v1 = vmul.f32 0.125, %v469_v63  ;;  %v461_v2 = vrot.slane %v460_v0, 1 }
 0x34c   :  { %900 = vmatmul.mubr.msk.f32.vlgmr.msra.gmra.mrb[4].mxu1 %vm433_vm2, %v472_v1  ;;  %v462_v5 = vadd.f32 %v461_v2, %v460_v0 }
 0x34d   :  { %921 = vmatprep.mubr.msk.f32.mxu1 %vm1075_vm1, %v1074_v17  ;;  %948 = vmatpush3.bf16.msra.mxu1 %v947_v13 }
 0x34e   :  { %v471_v7 = vmul.f32 0.125, %v462_v5  ;;  %949 = vmatprep.subr.bf16.mxu1 %v1077_v45 }
 0x350   :  { %895 = vmatmul.mubr.msk.f32.vlgmr.msra.gmra.mrb[4].mxu0 %vm433_vm2, %v471_v7 }
 0x351   :  { %942 = vmatpush3.bf16.msra.mxu0 %v941_v6  ;;  %910 = vmatprep.mubr.msk.f32.mxu0 %vm1075_vm1, %v1074_v17 }
 0x352   :  { %943 = vmatprep.subr.bf16.mxu0 %v1077_v45  ;;  %951 = vmatpush3.bf16.msra.mxu1 %v950_v22 }
 0x355   :  { %945 = vmatpush3.bf16.msra.mxu0 %v944_v10 }
 0x41f   :  { %v621_v14 = vpop.f32.mrb[4].mxu1 }
 0x420   :  { %v901_v15 = vpop.f32.mrb[5].mxu1  ;;  %v638_v16 = vrot.slane %v621_v14, 7 }
 0x423   :  { %v545_v17 = vpop.f32.mrb[4].mxu0 }
 0x424   :  { %v640_v18 = vsel %vm639_vm3, %v638_v16, %v545_v17  ;;  %v896_v19 = vpop.f32.mrb[5].mxu0 }
 0x425   :  { %911 = vmatmul.mubr.msk.f32.vlgmr.msra.gmra.mrb[6].mxu0 %vm107_vm0, %v640_v18 }
 0x4f8   :  { %v709_v24 = vpop.f32.mrb[6].mxu0 }
 0x4f9   :  { %v710_v25 = vadd.f32 %v825_v23, %v709_v24  ;;  %v912_v26 = vpop.f32.mrb[7].mxu0 }
 0x4fb   :  { %v713_v27 = vmax.f32 %v710_v25, 0.0 }
 0x4fd   :  { %922 = vmatmul.mubr.msk.f32.vlgmr.msra.gmra.mrb[6].mxu1 %vm107_vm0, %v713_v27 }
 0x5d0   :  { %v794_v29 = vpop.f32.mrb[6].mxu1 }
 0x5d1   :  { %v795_v30 = vadd.f32 %v827_v28, %v794_v29  ;;  %v923_v31 = vpop.f32.mrb[7].mxu1 }
 0x5d3   :  { %v829_v32 = vmul.f32 -1.442695, %v795_v30 }
 0x5d5   :  { %970 = vpow2.f32 %v829_v32 }
 0x5df   :  { %v971_v33 = vpop.eup %970 }
 0x5e0   :  { %v801_v34 = vadd.f32 1.0, %v971_v33 }
 0x5e2   :  { %972 = vrcp.f32 %v801_v34 }
 0x5ec   :  { %v973_v35 = vpop.eup %972 }
 0x5ed   :  { %805 = vst.msk [vmem:[%s1290_s10] sm:$0x3] %vm804_vm4, %v973_v35 }
 0x5ee   :  { %810 = vsyncpa [#allocation4], 1 }
 0x5ef   :  { %811 = vsyncpa [#allocation6], 1 }
 0x5f0   :  { %812 = vsyncpa [#allocation9], 1 }

</bundles_post_ra>
